<compile_context>
chip_gen: v6e
topology: v6e:2x2x1
jax: 0.10.0
libtpu: 0.0.40
codegen_flags: <defaults>
</compile_context>

<pallas_src>
import jax
import jax.numpy as jnp
from jax.experimental import pallas as pl
from jax.experimental.pallas import tpu as pltpu


_MAX_OUTSTANDING_DMAS = 8            # max concurrent chunk copies
_TARGET_CHUNK_BYTES = 8 * 1024 * 1024  # ~8 MiB per DMA chunk
_SMALL_COPY_BYTES = 1 * 1024 * 1024    # below this, plain XLA copy wins
_MAX_LANE_WIDTH = 8192                 # cap for lane-dense flattening


def _chunk_bounds(rows, cols, itemsize):
    """Static (start_row, n_rows) chunk list for the HBM->HBM DMA copy."""
    total_bytes = rows * cols * itemsize
    n_chunks = max(
        1,
        min(_MAX_OUTSTANDING_DMAS, -(-total_bytes // _TARGET_CHUNK_BYTES), rows),
    )
    chunk_rows = -(-rows // n_chunks)
    bounds = []
    r = 0
    while r < rows:
        n = min(chunk_rows, rows - r)
        bounds.append((r, n))
        r += n
    return bounds


def _hbm_copy_2d(x):
    """Direct HBM->HBM chunked-DMA copy of a 2-D array (no VMEM bounce)."""
    rows, cols = x.shape
    bounds = _chunk_bounds(rows, cols, x.dtype.itemsize)
    n_chunks = len(bounds)

    def kernel(src_hbm, dst_hbm, sems):
        # Start every chunk copy (up to _MAX_OUTSTANDING_DMAS concurrent
        # DMAs, each on its own semaphore slot), then wait for all of them.
        # Pure copy: no compute to overlap, the DMA engines run at HBM BW.
        copies = []
        for i, (start, n) in enumerate(bounds):  # static unroll
            cp = pltpu.make_async_copy(
                src_hbm.at[pl.ds(start, n), :],
                dst_hbm.at[pl.ds(start, n), :],
                sems.at[i],
            )
            cp.start()
            copies.append(cp)
        for cp in copies:
            cp.wait()

    return pl.pallas_call(
        kernel,
        out_shape=jax.ShapeDtypeStruct((rows, cols), x.dtype),
        in_specs=[pl.BlockSpec(memory_space=pl.ANY)],
        out_specs=pl.BlockSpec(memory_space=pl.ANY),
        scratch_shapes=[pltpu.SemaphoreType.DMA((n_chunks,))],
    )(x)


def _widest_lane_factor(total):
    """Widest multiple of 128 (<= cap) dividing `total`; prefer >= 8 rows."""
    best_any = 0
    best_tall = 0
    L = 128
    cap = min(_MAX_LANE_WIDTH, total)
    while L <= cap:
        if total % L == 0:
            best_any = L
            if total // L >= 8:
                best_tall = L
        L += 128
    return best_tall or best_any


def simple_encoder_forward(emb, *args, force_pallas=False):
    """Pallas materialization of SimpleEncoder.forward(*args) -> emb.

    `args` (node features / adjacency / ...) are accepted and ignored,
    exactly like the PyTorch module.  Returns a fresh buffer equal to `emb`.
    """
    del args  # forward ignores all inputs
    nodes, out_channels = emb.shape
    total = nodes * out_channels
    total_bytes = total * emb.dtype.itemsize

    if not force_pallas and total_bytes <= _SMALL_COPY_BYTES:
        # Kernel-launch overhead dominates a <= 1 MiB copy on every
        # generation; let XLA do the copy.
        return jnp.copy(emb)

    lane = _widest_lane_factor(total)
    if lane and lane != out_channels:
        # Lane-dense / descriptor-friendly path: present a (total//L, L) slab
        # to the DMA (contiguous reshape = layout plumbing, not compute).
        flat = emb.reshape(total // lane, lane)
        return _hbm_copy_2d(flat).reshape(nodes, out_channels)

    # Fallback: copy in native layout (HBM->HBM DMA works for any shape).
    return _hbm_copy_2d(emb)


class SimpleEncoderPallas:
    """Mirrors the PyTorch SimpleEncoder's parameter setup."""

    def __init__(self, in_channels, out_channels, nodes, key):
        self.in_channels = in_channels
        self.out_channels = out_channels * 6  # attribute only, as in PyTorch
        # torch.rand -> uniform [0, 1); emb uses the *original* out_channels,
        # not the *6 version (matches the reference exactly).
        self.emb = jax.random.uniform(
            key, (nodes, out_channels), dtype=jnp.float32
        )

    def __call__(self, *args):
        # Hot path: forward is an identity on the parameter — return it
        # directly (no kernel, no HBM traffic), same as PyTorch.
        return self.emb

    def materialize(self, *args, force_pallas=False):
        # Explicitly produce a fresh copy of the embedding (direct HBM->HBM
        # chunked-DMA kernel, or plain XLA copy for tiny embeddings).
        return simple_encoder_forward(self.emb, *args, force_pallas=force_pallas)


if __name__ == "__main__":
    key = jax.random.PRNGKey(0)
    k_emb, k_x = jax.random.split(key)

    in_channels = 4
    out_channels = 32   # embedding dim
    nodes = 8           # number of graph nodes

    enc = SimpleEncoderPallas(in_channels, out_channels, nodes, k_emb)

    # Dummy node-feature input, ignored by forward (matches forward(*args)).
    x = jax.random.normal(k_x, (nodes, in_channels), dtype=jnp.float32)

    # Hot path (what production forward uses): zero-copy identity.
    fast = enc(x)
    assert fast.shape == (nodes, out_channels)
    assert jnp.array_equal(fast, enc.emb)

    # Small-embedding short-circuit path (plain XLA copy, no kernel launch).
    small = jax.block_until_ready(enc.materialize(x))
    assert small.shape == (nodes, out_channels)
    assert jnp.array_equal(small, enc.emb)

    # Pallas HBM->HBM DMA kernel path, forced so the kernel runs here.
    out = jax.block_until_ready(enc.materialize(x, force_pallas=True))
    assert out.shape == (nodes, out_channels)
    assert jnp.array_equal(out, enc.emb)

    # Also exercise the lane-widened flatten path on a modest embedding
    # whose out_channels is not a multiple of 128.
    enc2 = SimpleEncoderPallas(4, 96, 512, jax.random.PRNGKey(1))
    out2 = jax.block_until_ready(enc2.materialize(force_pallas=True))
    assert out2.shape == (512, 96)
    assert jnp.array_equal(out2, enc2.emb)

    print("KERNEL_OK")
</pallas_src>

<mosaic_0001>
module attributes {stable_mosaic.version = 11 : i64} {
  func.func @kernel(%arg0: memref<1x256xf32, #tpu.memory_space<any>>, %arg1: memref<1x256xf32, #tpu.memory_space<any>>, %arg2: memref<1x!tpu.dma_semaphore, #tpu.memory_space<semaphore_mem>>) attributes {dimension_semantics = [], scalar_prefetch = 0 : i64, scratch_operands = 1 : i64, tpu.core_type = #tpu.core_type<tc>} {
    %c0_i32 = arith.constant 0 : i32
    %c0_i32_0 = arith.constant 0 : i32
    %c0_i32_1 = arith.constant 0 : i32
    %0 = tpu.memref_slice %arg0[%c0_i32_0, %c0_i32_1] : memref<1x256xf32, #tpu.memory_space<any>> -> memref<1x256xf32, #tpu.memory_space<any>>
    %c0_i32_2 = arith.constant 0 : i32
    %c0_i32_3 = arith.constant 0 : i32
    %1 = tpu.memref_slice %arg1[%c0_i32_2, %c0_i32_3] : memref<1x256xf32, #tpu.memory_space<any>> -> memref<1x256xf32, #tpu.memory_space<any>>
    %2 = tpu.memref_slice %arg2[%c0_i32] : memref<1x!tpu.dma_semaphore, #tpu.memory_space<semaphore_mem>> -> memref<1x!tpu.dma_semaphore, #tpu.memory_space<semaphore_mem>>
    %3 = tpu.memref_squeeze %2 : memref<1x!tpu.dma_semaphore, #tpu.memory_space<semaphore_mem>> -> memref<!tpu.dma_semaphore, #tpu.memory_space<semaphore_mem>>
    tpu.enqueue_dma source(%0 : memref<1x256xf32, #tpu.memory_space<any>>) target(%1 : memref<1x256xf32, #tpu.memory_space<any>>) target_semaphore(%3 : memref<!tpu.dma_semaphore, #tpu.memory_space<semaphore_mem>>)
    %c0_i32_4 = arith.constant 0 : i32
    %c0_i32_5 = arith.constant 0 : i32
    %c0_i32_6 = arith.constant 0 : i32
    %4 = tpu.memref_slice %arg0[%c0_i32_5, %c0_i32_6] : memref<1x256xf32, #tpu.memory_space<any>> -> memref<1x256xf32, #tpu.memory_space<any>>
    %c0_i32_7 = arith.constant 0 : i32
    %c0_i32_8 = arith.constant 0 : i32
    %5 = tpu.memref_slice %arg1[%c0_i32_7, %c0_i32_8] : memref<1x256xf32, #tpu.memory_space<any>> -> memref<1x256xf32, #tpu.memory_space<any>>
    %6 = tpu.memref_slice %arg2[%c0_i32_4] : memref<1x!tpu.dma_semaphore, #tpu.memory_space<semaphore_mem>> -> memref<1x!tpu.dma_semaphore, #tpu.memory_space<semaphore_mem>>
    %7 = tpu.memref_squeeze %6 : memref<1x!tpu.dma_semaphore, #tpu.memory_space<semaphore_mem>> -> memref<!tpu.dma_semaphore, #tpu.memory_space<semaphore_mem>>
    tpu.wait_dma2 semaphore(%7 : memref<!tpu.dma_semaphore, #tpu.memory_space<semaphore_mem>>) src(%4 : memref<1x256xf32, #tpu.memory_space<any>>) dst(%5 : memref<1x256xf32, #tpu.memory_space<any>>)
    return
  }
}

</mosaic_0001>

<bundles_post_ra>
// kernel: tpu_custom_call.1
= control target key start
LH: loop header
LB: loop body
LE: loop exit
PB: predicated region body
PF: predicated region fallthrough
CT: control target
= control target key end

     0   :  { %s28_s6 = smov [#allocation2]   ;;  %s29_s7 = smov 131072   ;;  %s47_s0 = inlined_call_operand.hbm [shape: f32[1,256], index: 0, kind: input, shape index: {}]   ;;  %s48_s1 = inlined_call_operand.hbm [shape: f32[1,256], index: 1, kind: output, shape index: {}]  }
   0x1   :  { %s30_s8 = smov 0  }
   0x2   :  { %12 = dma.general %s47_s0, 32, %s48_s1, %s28_s6, %s29_s7, [#allocation4], %s30_s8, 0  }
   0x3   :  { %26 = dma.done.wait [#allocation2], 32 }
   0x4   :  { %27 = vsyncadd [#allocation2], 4294967264 }
   0x5   :  { %16 = vsyncmov [#allocation2] }
   0x8   :  { %s17_s13 = vpop.sfrf %16 }
   0x9   :  { %p22_p0 = scmp.ne.s32.totalorder %s17_s13, 0 }
   0xb   :  { %21 = shalt.err (%p22_p0)  }

</bundles_post_ra>
